<compile_context>
chip_gen: v7x
topology: tpu7x:2x2x1
jax: 0.10.0
libtpu: 0.0.40
codegen_flags: <defaults>
</compile_context>

<pallas_src>
import jax
import jax.numpy as jnp
from jax.experimental import pallas as pl
from jax.experimental.pallas import tpu as pltpu


# ---------------------------------------------------------------------------
# Fused GEMM + bias + activation (+ residual) Pallas kernel
# ---------------------------------------------------------------------------

def _round_up(v, m):
    return ((v + m - 1) // m) * m


def _make_gemm_kernel(act, has_res):
    def kernel(*refs):
        if has_res:
            x_ref, w_ref, b_ref, r_ref, o_ref = refs
        else:
            x_ref, w_ref, b_ref, o_ref = refs
        acc = jnp.dot(x_ref[...], w_ref[...], preferred_element_type=jnp.float32)
        acc = acc + b_ref[...]                     # (1, N) broadcasts over rows
        if act == "relu":
            acc = jnp.maximum(acc, 0.0)
        if has_res:
            acc = acc + r_ref[...]                 # fused residual add
        o_ref[...] = acc.astype(o_ref.dtype)
    return kernel


def gemm_bias_act(x, w, b, *, act=None, res=None, tm_max=512):
    """out = act(x @ w + b) (+ res).  x:(M,K)  w:(K,N)  b:(1,N)  res:(M,N)."""
    M, K = x.shape
    Kw, N = w.shape
    assert K == Kw
    tm = min(_round_up(M, 8), tm_max)
    Mp = _round_up(M, tm)
    if Mp != M:
        x = jnp.pad(x, ((0, Mp - M), (0, 0)))
        if res is not None:
            res = jnp.pad(res, ((0, Mp - M), (0, 0)))

    in_specs = [
        pl.BlockSpec((tm, K), lambda i: (i, 0)),   # row slab of X
        pl.BlockSpec((K, N), lambda i: (0, 0)),    # full weight
        pl.BlockSpec((1, N), lambda i: (0, 0)),    # bias
    ]
    args = [x, w, b]
    if res is not None:
        in_specs.append(pl.BlockSpec((tm, N), lambda i: (i, 0)))
        args.append(res)

    out = pl.pallas_call(
        _make_gemm_kernel(act, res is not None),
        out_shape=jax.ShapeDtypeStruct((Mp, N), x.dtype),
        grid_spec=pltpu.PrefetchScalarGridSpec(
            num_scalar_prefetch=0,
            grid=(Mp // tm,),
            in_specs=in_specs,
            out_specs=pl.BlockSpec((tm, N), lambda i: (i, 0)),
        ),
        compiler_params=pltpu.CompilerParams(
            dimension_semantics=("parallel",),
        ),
    )(*args)
    return out[:M]


def _gemm_ref(x, w, b, *, act=None, res=None):
    """Pure-JAX reference for the fused GEMM kernel."""
    out = x @ w + b
    if act == "relu":
        out = jnp.maximum(out, 0.0)
    if res is not None:
        out = out + res
    return out


# ---------------------------------------------------------------------------
# Layout plumbing (wrapper side): im2col, nearest upsample, NCHW<->GEMM views
# ---------------------------------------------------------------------------

def _im2col(x_nchw, ksize=3, stride=1, padding=1):
    B, C, H, W = x_nchw.shape
    xp = jnp.pad(x_nchw, ((0, 0), (0, 0), (padding, padding), (padding, padding)))
    Ho = (H + 2 * padding - ksize) // stride + 1
    Wo = (W + 2 * padding - ksize) // stride + 1
    cols = []
    for di in range(ksize):
        for dj in range(ksize):
            cols.append(xp[:, :, di:di + stride * Ho:stride, dj:dj + stride * Wo:stride])
    col = jnp.stack(cols, axis=2)                      # (B, C, k*k, Ho, Wo)
    col = col.reshape(B, C * ksize * ksize, Ho, Wo)
    col = col.transpose(0, 2, 3, 1).reshape(B * Ho * Wo, C * ksize * ksize)
    return col, Ho, Wo


def _col_out_to_nchw(out, B, Ho, Wo):
    C_out = out.shape[-1]
    return out.reshape(B, Ho, Wo, C_out).transpose(0, 3, 1, 2)


def _upsample2x(x_nchw):
    return jnp.repeat(jnp.repeat(x_nchw, 2, axis=2), 2, axis=3)


# ---------------------------------------------------------------------------
# CompressionDAE forward
# ---------------------------------------------------------------------------

def compression_dae_forward(x, params, *, on=True, residual=True, use_pallas=True):
    if not on:
        # turn_off() path: pure identity -> no Pallas call, no HBM copy.
        return x

    gemm = gemm_bias_act if use_pallas else _gemm_ref
    B, C, H, W = x.shape
    h = x

    # ---- encoder: depth x (3x3 conv, stride 2, ReLU) ----
    for (w, b) in params["enc"]:
        col, Ho, Wo = _im2col(h, stride=2, padding=1)
        out = gemm(col, w, b, act="relu")
        h = _col_out_to_nchw(out, B, Ho, Wo)

    # ---- dense bottleneck (latent='dense') ----
    _, Cb, Hb, Wb = h.shape
    flat = h.reshape(B, Cb * Hb * Wb)
    z = gemm(flat, params["fc_enc"][0], params["fc_enc"][1], act=None)
    d = gemm(z, params["fc_dec"][0], params["fc_dec"][1], act="relu")
    h = d.reshape(B, Cb, Hb, Wb)

    # ---- decoder: depth x (nearest upsample x2, 3x3 conv) ----
    n_dec = len(params["dec"])
    for li, (w, b) in enumerate(params["dec"]):
        h = _upsample2x(h)
        col, Ho, Wo = _im2col(h, stride=1, padding=1)
        is_last = li == n_dec - 1
        if is_last and residual:
            # Fuse the residual add (x + ae_out) into the final conv GEMM.
            res_flat = x.transpose(0, 2, 3, 1).reshape(B * H * W, C)
            out = gemm(col, w, b, act=None, res=res_flat)
        else:
            out = gemm(col, w, b, act=None if is_last else "relu")
        h = _col_out_to_nchw(out, B, Ho, Wo)

    return h


# ---------------------------------------------------------------------------
# Deterministic parameter init (weights stored pre-transposed for col @ W)
# ---------------------------------------------------------------------------

def init_params(key, in_channels=4, in_dim=16, latent_dim=32, depth=3):
    keys = jax.random.split(key, 4 * depth + 8)
    ki = iter(range(len(keys)))
    scale = jnp.float32(0.05)

    enc = []
    c, dim = in_channels, in_dim
    for _ in range(depth):
        c_out = c * 2
        w = jax.random.normal(keys[next(ki)], (c * 9, c_out), jnp.float32) * scale
        b = jax.random.normal(keys[next(ki)], (1, c_out), jnp.float32) * scale
        enc.append((w, b))
        c, dim = c_out, dim // 2

    flat = c * dim * dim
    fc_enc = (jax.random.normal(keys[next(ki)], (flat, latent_dim), jnp.float32) * scale,
              jax.random.normal(keys[next(ki)], (1, latent_dim), jnp.float32) * scale)
    fc_dec = (jax.random.normal(keys[next(ki)], (latent_dim, flat), jnp.float32) * scale,
              jax.random.normal(keys[next(ki)], (1, flat), jnp.float32) * scale)

    dec = []
    for d in range(depth):
        c_out = c // 2 if d < depth - 1 else in_channels
        w = jax.random.normal(keys[next(ki)], (c * 9, c_out), jnp.float32) * scale
        b = jax.random.normal(keys[next(ki)], (1, c_out), jnp.float32) * scale
        dec.append((w, b))
        c = c_out

    return {"enc": enc, "fc_enc": fc_enc, "fc_dec": fc_dec, "dec": dec}


# ---------------------------------------------------------------------------

if __name__ == "__main__":
    key = jax.random.PRNGKey(0)
    kx, kp = jax.random.split(key)

    # NCHW input: batch=2, channels=4, 16x16 spatial; latent_dim=32, depth=3
    x = jax.random.normal(kx, (2, 4, 16, 16), dtype=jnp.float32)
    params = init_params(kp, in_channels=4, in_dim=16, latent_dim=32, depth=3)

    # Pallas forward (on + residual): y = x + AE(x)
    y = compression_dae_forward(x, params, on=True, residual=True, use_pallas=True)
    y = jax.block_until_ready(y)
    assert y.shape == x.shape and y.dtype == x.dtype
    assert bool(jnp.all(jnp.isfinite(y)))

    # Correctness vs pure-JAX reference of the same network.
    y_ref = compression_dae_forward(x, params, on=True, residual=True, use_pallas=False)
    y_ref = jax.block_until_ready(y_ref)
    assert bool(jnp.allclose(y, y_ref, atol=1e-3, rtol=1e-3))

    # turn_off() path: identity with zero copies (short-circuit, no kernel).
    y_off = compression_dae_forward(x, params, on=False)
    assert y_off is x

    print("KERNEL_OK")
</pallas_src>

<mosaic_0001>
module attributes {stable_mosaic.version = 11 : i64} {
  func.func @kernel(%arg0: i32, %arg1: memref<128x36xf32, #tpu.memory_space<vmem>>, %arg2: memref<36x8xf32, #tpu.memory_space<vmem>>, %arg3: memref<1x8xf32, #tpu.memory_space<vmem>>, %arg4: memref<128x8xf32, #tpu.memory_space<vmem>>) attributes {dimension_semantics = [#tpu.dimension_semantics<parallel>], iteration_bounds = array<i64: 1>, scalar_prefetch = 0 : i64, scratch_operands = 0 : i64, tpu.core_type = #tpu.core_type<tc>, window_params = [{transform_indices = @transform_0, window_bounds = array<i64: 128, 36>}, {pipeline_mode = #tpu.pipeline_mode<synchronous>, transform_indices = @transform_1, window_bounds = array<i64: 36, 8>}, {pipeline_mode = #tpu.pipeline_mode<synchronous>, transform_indices = @transform_2, window_bounds = array<i64: 1, 8>}, {transform_indices = @transform_3, window_bounds = array<i64: 128, 8>}]} {
    %c0 = arith.constant 0 : index
    %c0_0 = arith.constant 0 : index
    %0 = vector.load %arg1[%c0, %c0_0] : memref<128x36xf32, #tpu.memory_space<vmem>>, vector<128x36xf32>
    %c0_1 = arith.constant 0 : index
    %c0_2 = arith.constant 0 : index
    %1 = vector.load %arg2[%c0_1, %c0_2] : memref<36x8xf32, #tpu.memory_space<vmem>>, vector<36x8xf32>
    %cst = arith.constant dense<0.000000e+00> : vector<128x8xf32>
    %2 = tpu.matmul %0, %1, %cst {dimension_numbers = #tpu.dot_dimension_numbers<[1], [0], [0], [1], [0, 0, 1, 1], [], []>} : vector<128x36xf32>, vector<36x8xf32>, vector<128x8xf32> -> vector<128x8xf32>
    %c0_3 = arith.constant 0 : index
    %c0_4 = arith.constant 0 : index
    %3 = vector.load %arg3[%c0_3, %c0_4] : memref<1x8xf32, #tpu.memory_space<vmem>>, vector<1x8xf32>
    %4 = vector.broadcast %3 : vector<1x8xf32> to vector<128x8xf32>
    %5 = arith.addf %2, %4 : vector<128x8xf32>
    %cst_5 = arith.constant 0.000000e+00 : f32
    %6 = vector.broadcast %cst_5 : f32 to vector<128x8xf32>
    %7 = arith.maximumf %5, %6 : vector<128x8xf32>
    %c0_6 = arith.constant 0 : index
    %c0_7 = arith.constant 0 : index
    %8 = vector.load %arg4[%c0_6, %c0_7] : memref<128x8xf32, #tpu.memory_space<vmem>>, vector<128x8xf32>
    tpu.vector_store %arg4[%c0_6, %c0_7], %7 {strides = array<i32>} : memref<128x8xf32, #tpu.memory_space<vmem>>, vector<128x8xf32>,
    return
  }
  func.func @transform_0(%arg0: i32) -> (i32, i32) {
    %c0_i32 = arith.constant 0 : i32
    %c0_i32_0 = arith.constant 0 : i32
    return %arg0, %c0_i32 : i32, i32
  }
  func.func @transform_1(%arg0: i32) -> (i32, i32) {
    %c0_i32 = arith.constant 0 : i32
    %c0_i32_0 = arith.constant 0 : i32
    %c0_i32_1 = arith.constant 0 : i32
    return %c0_i32, %c0_i32_0 : i32, i32
  }
  func.func @transform_2(%arg0: i32) -> (i32, i32) {
    %c0_i32 = arith.constant 0 : i32
    %c0_i32_0 = arith.constant 0 : i32
    %c0_i32_1 = arith.constant 0 : i32
    return %c0_i32, %c0_i32_0 : i32, i32
  }
  func.func @transform_3(%arg0: i32) -> (i32, i32) {
    %c0_i32 = arith.constant 0 : i32
    %c0_i32_0 = arith.constant 0 : i32
    return %arg0, %c0_i32 : i32, i32
  }
}

</mosaic_0001>

<bundles_post_ra>
// kernel: tpu_custom_call.1
= control target key start
LH: loop header
LB: loop body
LE: loop exit
PB: predicated region body
PF: predicated region fallthrough
CT: control target
= control target key end

     0   :  { %vm42_vm0 = vcmask 293888   ;;  %vm91_vm1 = vcmask 1043456   ;;  %vm256_vm2 = vcmask 64512   ;;  %s530_s1 = inlined_call_operand.vmem [shape: f32[36,8], index: 1, kind: input, shape index: {}]   ;;  %s531_s0 = inlined_call_operand.vmem [shape: f32[128,36], index: 0, kind: input, shape index: {}]   ;;  %s532_s2 = inlined_call_operand.vmem [shape: f32[1,8], index: 2, kind: input, shape index: {}]   ;;  %s533_s3 = inlined_call_operand.vmem [shape: f32[128,8], index: 3, kind: output, shape index: {}]  }
   0x1   :  { %v30_v0 = vld [vmem:[%s530_s1] sm:$0xff]  ;;  %v31_v1 = vld [vmem:[%s530_s1 + $0x8] sm:$0xff]  ;;  %v32_v2 = vld [vmem:[%s530_s1 + $0x10] sm:$0xff] }
   0x2   :  { %v350_v3 = vpack.c.bf16 %v31_v1, %v30_v0  ;;  %v33_v4 = vld [vmem:[%s530_s1 + $0x18] sm:$0xff]  ;;  %v14_v5 = vld [vmem:[%s531_s0] sm:$0xff]  ;;  %v15_v9 = vld [vmem:[%s531_s0 + $0x8] sm:$0xff] }
   0x3   :  { %v354_v6 = vpack.c.bf16 %v33_v4, %v32_v2  ;;  %326 = vmatprep.mubr.msk.f32.mxu0 %vm42_vm0, %v14_v5  ;;  %v22_v7 = vld [vmem:[%s531_s0 + $0x40] sm:$0xff]  ;;  %v23_v10 = vld [vmem:[%s531_s0 + $0x48] sm:$0xff]  ;;  %v16_v11 = vld [vmem:[%s531_s0 + $0x10] sm:$0xff] }
   0x4   :  { %351 = vmatprep.subr.bf16.mxu0 %v350_v3  ;;  %358 = vmatprep.subr.bf16.mxu1 %v350_v3  ;;  %v34_v8 = vld [vmem:[%s530_s1 + $0x20] sm:$0xf]  ;;  %v24_v12 = vld [vmem:[%s531_s0 + $0x50] sm:$0xff]  ;;  %v17_v13 = vld [vmem:[%s531_s0 + $0x18] sm:$0xff] }
   0x5   :  { %353 = vmatpush3.bf16.msra.mxu0 %v350_v3  ;;  %361 = vmatpush3.bf16.msra.mxu1 %v350_v3  ;;  %v25_v14 = vld [vmem:[%s531_s0 + $0x58] sm:$0xff]  ;;  %v18_v15 = vld [vmem:[%s531_s0 + $0x20] sm:$0xff]  ;;  %v19_v17 = vld [vmem:[%s531_s0 + $0x28] sm:$0xff] }
   0x6   :  { %355 = vmatprep.subr.bf16.mxu0 %v354_v6  ;;  %359 = vmatprep.subr.bf16.mxu1 %v354_v6  ;;  %v26_v16 = vld [vmem:[%s531_s0 + $0x60] sm:$0xff]  ;;  %v27_v18 = vld [vmem:[%s531_s0 + $0x68] sm:$0xff]  ;;  %v20_v19 = vld [vmem:[%s531_s0 + $0x30] sm:$0xff] }
   0x7   :  { %338 = vmatprep.mubr.msk.f32.mxu1 %vm42_vm0, %v22_v7  ;;  %v28_v20 = vld [vmem:[%s531_s0 + $0x70] sm:$0xff]  ;;  %v21_v21 = vld [vmem:[%s531_s0 + $0x38] sm:$0xff]  ;;  %v277_v23 = vld [vmem:[%s532_s2] ss:$0 sm:$0xff] }
   0x8   :  { %v29_v22 = vld [vmem:[%s531_s0 + $0x78] sm:$0xff] }
   0x9   :  { %357 = vmatpush3.bf16.msra.mxu0 %v354_v6  ;;  %362 = vmatpush3.bf16.msra.mxu1 %v354_v6 }
   0xa   :  { %324 = vmatprep.subr.msk.mxu0 %vm91_vm1, %v34_v8  ;;  %360 = vmatprep.subr.msk.mxu1 %vm91_vm1, %v34_v8 }
   0xd   :  { %325 = vmatpush3.msk.msra.mxu0 %vm91_vm1, %v34_v8  ;;  %363 = vmatpush3.msk.msra.mxu1 %vm91_vm1, %v34_v8 }
   0xe   :  { %327 = vmatmul.mubr.msk.f32.vlgmr.msra.gmra.mrb[0].mxu0 %vm42_vm0, %v15_v9  ;;  %339 = vmatmul.mubr.msk.f32.vlgmr.msra.gmra.mrb[0].mxu1 %vm42_vm0, %v23_v10 }
   0xf   :  { %329 = vmatprep.mubr.msk.f32.mxu0 %vm42_vm0, %v16_v11  ;;  %341 = vmatprep.mubr.msk.f32.mxu1 %vm42_vm0, %v24_v12 }
  0x12   :  { %330 = vmatmul.mubr.msk.f32.gmra.mrb[2].mxu0 %vm42_vm0, %v17_v13  ;;  %342 = vmatmul.mubr.msk.f32.gmra.mrb[2].mxu1 %vm42_vm0, %v25_v14 }
  0x13   :  { %332 = vmatprep.mubr.msk.f32.mxu0 %vm42_vm0, %v18_v15  ;;  %344 = vmatprep.mubr.msk.f32.mxu1 %vm42_vm0, %v26_v16 }
  0x16   :  { %333 = vmatmul.mubr.msk.f32.gmra.mrb[4].mxu0 %vm42_vm0, %v19_v17  ;;  %345 = vmatmul.mubr.msk.f32.gmra.mrb[4].mxu1 %vm42_vm0, %v27_v18 }
  0x17   :  { %335 = vmatprep.mubr.msk.f32.mxu0 %vm42_vm0, %v20_v19  ;;  %347 = vmatprep.mubr.msk.f32.mxu1 %vm42_vm0, %v28_v20 }
  0x1a   :  { %336 = vmatmul.mubr.msk.f32.gmra.mrb[6].mxu0 %vm42_vm0, %v21_v21  ;;  %348 = vmatmul.mubr.msk.f32.gmra.mrb[6].mxu1 %vm42_vm0, %v29_v22 }
  0xe1   :  { %v328_v24 = vpop.f32.mrb[0].mxu0  ;;  %v340_v25 = vpop.f32.mrb[0].mxu1 }
  0xe2   :  { %v167_v26 = vadd.f32 %v328_v24, %v277_v23  ;;  %v207_v27 = vadd.f32 %v340_v25, %v277_v23  ;;  %v161_v28 = vpop.f32.mrb[1].mxu0  ;;  %v201_v29 = vpop.f32.mrb[1].mxu1 }
  0xe3   :  { %v162_v30 = vadd.f32 %v277_v23, %v161_v28  ;;  %v202_v31 = vadd.f32 %v277_v23, %v201_v29 }
  0xe4   :  { %v241_v32 = vmax.f32 %v167_v26, 0.0  ;;  %v249_v33 = vmax.f32 %v207_v27, 0.0 }
  0xe5   :  { %v240_v34 = vmax.f32 %v162_v30, 0.0  ;;  %v248_v35 = vmax.f32 %v202_v31, 0.0  ;;  %v331_v36 = vpop.f32.mrb[2].mxu0  ;;  %v343_v37 = vpop.f32.mrb[2].mxu1 }
  0xe6   :  { %258 = vst.msk [vmem:[%s533_s3 + $0x8] sm:$0xff] %vm256_vm2, %v241_v32  ;;  %266 = vst.msk [vmem:[%s533_s3 + $0x48] sm:$0xff] %vm256_vm2, %v249_v33  ;;  %v177_v38 = vadd.f32 %v331_v36, %v277_v23  ;;  %v217_v39 = vadd.f32 %v343_v37, %v277_v23  ;;  %v171_v40 = vpop.f32.mrb[3].mxu0  ;;  %v211_v41 = vpop.f32.mrb[3].mxu1 }
  0xe7   :  { %257 = vst.msk [vmem:[%s533_s3] sm:$0xff] %vm256_vm2, %v240_v34  ;;  %265 = vst.msk [vmem:[%s533_s3 + $0x40] sm:$0xff] %vm256_vm2, %v248_v35  ;;  %v172_v42 = vadd.f32 %v277_v23, %v171_v40  ;;  %v212_v43 = vadd.f32 %v277_v23, %v211_v41 }
  0xe8   :  { %v243_v44 = vmax.f32 %v177_v38, 0.0  ;;  %v251_v45 = vmax.f32 %v217_v39, 0.0 }
  0xe9   :  { %v242_v46 = vmax.f32 %v172_v42, 0.0  ;;  %v250_v47 = vmax.f32 %v212_v43, 0.0  ;;  %v334_v48 = vpop.f32.mrb[4].mxu0  ;;  %v346_v49 = vpop.f32.mrb[4].mxu1 }
  0xea   :  { %260 = vst.msk [vmem:[%s533_s3 + $0x18] sm:$0xff] %vm256_vm2, %v243_v44  ;;  %268 = vst.msk [vmem:[%s533_s3 + $0x58] sm:$0xff] %vm256_vm2, %v251_v45  ;;  %v187_v50 = vadd.f32 %v334_v48, %v277_v23  ;;  %v227_v51 = vadd.f32 %v346_v49, %v277_v23  ;;  %v181_v52 = vpop.f32.mrb[5].mxu0  ;;  %v221_v53 = vpop.f32.mrb[5].mxu1 }
  0xeb   :  { %259 = vst.msk [vmem:[%s533_s3 + $0x10] sm:$0xff] %vm256_vm2, %v242_v46  ;;  %267 = vst.msk [vmem:[%s533_s3 + $0x50] sm:$0xff] %vm256_vm2, %v250_v47  ;;  %v182_v54 = vadd.f32 %v277_v23, %v181_v52  ;;  %v222_v55 = vadd.f32 %v277_v23, %v221_v53 }
  0xec   :  { %v245_v56 = vmax.f32 %v187_v50, 0.0  ;;  %v253_v57 = vmax.f32 %v227_v51, 0.0 }
  0xed   :  { %v244_v58 = vmax.f32 %v182_v54, 0.0  ;;  %v252_v59 = vmax.f32 %v222_v55, 0.0  ;;  %v337_v60 = vpop.f32.mrb[6].mxu0  ;;  %v349_v61 = vpop.f32.mrb[6].mxu1 }
  0xee   :  { %262 = vst.msk [vmem:[%s533_s3 + $0x28] sm:$0xff] %vm256_vm2, %v245_v56  ;;  %270 = vst.msk [vmem:[%s533_s3 + $0x68] sm:$0xff] %vm256_vm2, %v253_v57  ;;  %v197_v62 = vadd.f32 %v337_v60, %v277_v23  ;;  %v237_v63 = vadd.f32 %v349_v61, %v277_v23  ;;  %v191_v0 = vpop.f32.mrb[7].mxu0  ;;  %v231_v1 = vpop.f32.mrb[7].mxu1 }
  0xef   :  { %261 = vst.msk [vmem:[%s533_s3 + $0x20] sm:$0xff] %vm256_vm2, %v244_v58  ;;  %269 = vst.msk [vmem:[%s533_s3 + $0x60] sm:$0xff] %vm256_vm2, %v252_v59  ;;  %v192_v2 = vadd.f32 %v277_v23, %v191_v0  ;;  %v232_v3 = vadd.f32 %v277_v23, %v231_v1 }
  0xf0   :  { %v247_v4 = vmax.f32 %v197_v62, 0.0  ;;  %v255_v5 = vmax.f32 %v237_v63, 0.0 }
  0xf1   :  { %v246_v6 = vmax.f32 %v192_v2, 0.0  ;;  %v254_v7 = vmax.f32 %v232_v3, 0.0 }
  0xf2   :  { %264 = vst.msk [vmem:[%s533_s3 + $0x38] sm:$0xff] %vm256_vm2, %v247_v4  ;;  %272 = vst.msk [vmem:[%s533_s3 + $0x78] sm:$0xff] %vm256_vm2, %v255_v5 }
  0xf3   :  { %263 = vst.msk [vmem:[%s533_s3 + $0x30] sm:$0xff] %vm256_vm2, %v246_v6  ;;  %271 = vst.msk [vmem:[%s533_s3 + $0x70] sm:$0xff] %vm256_vm2, %v254_v7 }

</bundles_post_ra>
